<compile_context>
chip_gen: v7x
topology: tpu7x:2x2x1
jax: 0.10.0
libtpu: 0.0.40
codegen_flags: <defaults>
</compile_context>

<pallas_src>
import functools

import jax
import jax.numpy as jnp
from jax.experimental import pallas as pl
from jax.experimental.pallas import tpu as pltpu

EPS = 1e-5  # nn.BatchNorm1d default eps


def _pick_tile(length):
    """Largest lane-dense tile (multiple of 128) dividing L; else whole L."""
    for t in (1024, 512, 256, 128):
        if length % t == 0:
            return t
    # TODO(synk): very long sequences not divisible by 128 would want a padded
    # layout (one extra HBM pass) or BoundedSlice tiles; whole-L tiles are fine
    # for the lengths this module is used with.
    return length


def _conv_relu_stats_kernel(x_ref, hl_ref, hr_ref, w_ref, b_ref, aff_ref,
                            y_ref, stats_ref, *, apply_affine):
    """(optional per-channel input affine) -> Conv1d(k=3,p=1) -> ReLU over one
    (C, TILE) tile, accumulating per-channel sum / sum-of-squares for the
    following BatchNorm.

    x_ref    : (C_in, T)        activation tile of one batch element
    hl_ref   : (C_in, 1)        column left of the tile (0 at sequence start)
    hr_ref   : (C_in, 1)        column right of the tile (0 at sequence end)
    w_ref    : (3, C_out, C_in) conv taps (tap k multiplies x[l-1+k])
    b_ref    : (C_out, 1)       conv bias
    aff_ref  : (C_in, 2)        [scale, shift] of the previous layer's BN
    y_ref    : (C_out, T)       raw (pre-BN) post-ReLU output tile
    stats_ref: (C_out, 128)     col 0 = running sum, col 1 = running sum of sq.
    """
    first = (pl.program_id(0) == 0) & (pl.program_id(1) == 0)

    @pl.when(first)
    def _():
        stats_ref[...] = jnp.zeros_like(stats_ref)

    x = x_ref[...]
    hl = hl_ref[...]
    hr = hr_ref[...]
    if apply_affine:
        # Previous layer's BatchNorm fused here as one per-channel FMA.
        # The halo columns are already in this domain (wrapper applied it).
        x = x * aff_ref[:, 0:1] + aff_ref[:, 1:2]

    tile = x.shape[-1]
    # Shifted operands: interior columns from the tile itself, edge columns from
    # the 1-wide halos (exact zeros at sequence boundaries = conv zero padding).
    x_lm1 = jnp.concatenate([hl, x[:, :tile - 1]], axis=1)   # col l holds x[l-1]
    x_lp1 = jnp.concatenate([x[:, 1:], hr], axis=1)          # col l holds x[l+1]

    # Three accumulated tap matmuls — no (3*C_in, T) concat operand.
    y = jnp.dot(w_ref[0], x_lm1, preferred_element_type=jnp.float32)
    y = y + jnp.dot(w_ref[1], x, preferred_element_type=jnp.float32)
    y = y + jnp.dot(w_ref[2], x_lp1, preferred_element_type=jnp.float32)
    y = jnp.maximum(y + b_ref[...], 0.0)

    y_ref[...] = y.astype(y_ref.dtype)

    # BatchNorm statistics over the whole (N, L) batch, accumulated across the
    # grid in the VMEM-resident stats output (constant index_map).
    stats_ref[:, 0:1] += jnp.sum(y, axis=-1, keepdims=True)
    stats_ref[:, 1:2] += jnp.sum(y * y, axis=-1, keepdims=True)


def _bn_apply_kernel(y_ref, aff_ref, o_ref):
    """Second BN pass: per-channel y * scale + shift on one (C, TILE) tile."""
    o_ref[...] = y_ref[...] * aff_ref[:, 0:1] + aff_ref[:, 1:2]


def _make_halos(a, tile, scale=None, shift=None):
    """Gather 1-column left/right halos for every (batch, tile) block.

    Returns two (N*T, C, 1) arrays.  Sequence-boundary halos are exact zeros
    (Conv1d zero padding).  If scale/shift are given, real halo columns are
    mapped into the conv-input (post-BN) domain first.
    """
    n, c, length = a.shape
    n_t = length // tile
    zero = jnp.zeros((n, c, 1), jnp.float32)
    if n_t == 1:
        return zero, zero
    left = a[:, :, tile - 1:length - 1:tile]     # cols t*tile - 1,  t = 1..T-1
    right = a[:, :, tile::tile]                  # cols (t+1)*tile,  t = 0..T-2
    if scale is not None:
        left = left * scale[None, :, None] + shift[None, :, None]
        right = right * scale[None, :, None] + shift[None, :, None]
    hl = jnp.concatenate([zero, left], axis=2)               # (N, C, T)
    hr = jnp.concatenate([right, zero], axis=2)
    hl = jnp.transpose(hl, (0, 2, 1)).reshape(n * n_t, c)[:, :, None]
    hr = jnp.transpose(hr, (0, 2, 1)).reshape(n * n_t, c)[:, :, None]
    return hl, hr


def _conv_relu_stats(x, w, b, affine, tile):
    """One (affine?) -> conv -> ReLU pass; returns raw activation + BN stats."""
    n, c_in, length = x.shape
    c_out = w.shape[0]
    n_t = length // tile
    apply_affine = affine is not None

    w_taps = jnp.transpose(w.astype(jnp.float32), (2, 0, 1))   # (3, C_out, C_in)
    b_col = b.astype(jnp.float32)[:, None]                     # (C_out, 1)
    if apply_affine:
        scale, shift = affine
        aff = jnp.stack([scale, shift], axis=1)                # (C_in, 2)
        hl, hr = _make_halos(x, tile, scale, shift)
    else:
        aff = jnp.zeros((c_in, 2), jnp.float32)                # unused (static flag)
        hl, hr = _make_halos(x, tile)

    # Explicit VMEM budget: double-buffered activation blocks + resident params.
    block_bytes = 4 * tile * (c_in + c_out)
    vmem_limit = int(min(max(16 * block_bytes + (1 << 20), 8 << 20), 32 << 20))

    kernel = functools.partial(_conv_relu_stats_kernel, apply_affine=apply_affine)
    y_raw, stats = pl.pallas_call(
        kernel,
        grid=(n, n_t),
        in_specs=(
            pl.BlockSpec((None, c_in, tile), lambda i, t: (i, 0, t)),
            pl.BlockSpec((None, c_in, 1), lambda i, t: (i * n_t + t, 0, 0)),
            pl.BlockSpec((None, c_in, 1), lambda i, t: (i * n_t + t, 0, 0)),
            pl.BlockSpec((3, c_out, c_in), lambda i, t: (0, 0, 0)),   # resident
            pl.BlockSpec((c_out, 1), lambda i, t: (0, 0)),            # resident
            pl.BlockSpec((c_in, 2), lambda i, t: (0, 0)),             # resident
        ),
        out_specs=(
            pl.BlockSpec((None, c_out, tile), lambda i, t: (i, 0, t)),
            pl.BlockSpec((c_out, 128), lambda i, t: (0, 0)),          # accumulator
        ),
        out_shape=(
            jax.ShapeDtypeStruct((n, c_out, length), jnp.float32),
            jax.ShapeDtypeStruct((c_out, 128), jnp.float32),
        ),
        compiler_params=pltpu.CompilerParams(
            # Stats output is carried across every grid step -> both axes stay
            # "arbitrary".  (A megacore split would need per-core partials in
            # CMEM/VMEM_SHARED; not worth it at these channel counts.)
            dimension_semantics=("arbitrary", "arbitrary"),
            vmem_limit_bytes=vmem_limit,
        ),
        cost_estimate=pl.CostEstimate(
            flops=2 * 3 * c_out * c_in * n * length + 8 * c_out * n * length,
            transcendentals=0,
            bytes_accessed=4 * (x.size + hl.size + hr.size + w_taps.size
                                + n * c_out * length + c_out * 128),
        ),
    )(x.astype(jnp.float32), hl, hr, w_taps, b_col, aff)
    return y_raw, stats


def _bn_scale_shift(stats, gamma, beta, count):
    """Per-channel BatchNorm scale/shift from [sum, sumsq] (training mode)."""
    mean = stats[:, 0] / count
    var = stats[:, 1] / count - mean * mean          # biased variance
    scale = gamma * jax.lax.rsqrt(var + EPS)
    shift = beta - mean * scale
    return scale, shift


def _bn_apply(y, scale, shift, tile):
    """BN second pass: tiled per-channel affine, fully parallel grid."""
    n, c, length = y.shape
    n_t = length // tile
    aff = jnp.stack([scale, shift], axis=1)          # (C, 2)
    vmem_limit = int(min(max(16 * 4 * tile * c + (1 << 20), 8 << 20), 32 << 20))
    return pl.pallas_call(
        _bn_apply_kernel,
        grid=(n, n_t),
        in_specs=(
            pl.BlockSpec((None, c, tile), lambda i, t: (i, 0, t)),
            pl.BlockSpec((c, 2), lambda i, t: (0, 0)),               # resident
        ),
        out_specs=pl.BlockSpec((None, c, tile), lambda i, t: (i, 0, t)),
        out_shape=jax.ShapeDtypeStruct((n, c, length), jnp.float32),
        compiler_params=pltpu.CompilerParams(
            dimension_semantics=("parallel", "parallel"),
            vmem_limit_bytes=vmem_limit,
        ),
    )(y, aff)


def conv_block1d(x, w1, b1, w2, b2, g1, be1, g2, be2, tile=None):
    """Forward pass of Conv_block1D: (Conv1d(3,1,1) -> ReLU -> BatchNorm1d) x 2.

    x : (N, C_in, L);  w1: (C_out, C_in, 3);  w2: (C_out, C_out, 3)
    b*, g*, be*: (C_out,)  (conv bias, BN weight, BN bias)
    """
    n, c_in, length = x.shape
    if tile is None:
        tile = _pick_tile(length)
    assert length % tile == 0, (length, tile)
    count = float(n * length)

    # Layer 1: conv -> ReLU (+ BN1 statistics).
    h_raw, stats1 = _conv_relu_stats(x, w1, b1, None, tile)
    scale1, shift1 = _bn_scale_shift(stats1, g1, be1, count)

    # Layer 2: BN1 (fused input affine) -> conv -> ReLU (+ BN2 statistics).
    y_raw, stats2 = _conv_relu_stats(h_raw, w2, b2, (scale1, shift1), tile)
    scale2, shift2 = _bn_scale_shift(stats2, g2, be2, count)

    # BN2 second pass.
    return _bn_apply(y_raw, scale2, shift2, tile)


def reference_forward(x, w1, b1, w2, b2, g1, be1, g2, be2):
    """Pure-JAX reference matching PyTorch training-mode forward."""
    def layer(x, w, b, g, be):
        y = jax.lax.conv_general_dilated(
            x, w, window_strides=(1,), padding=((1, 1),),
            dimension_numbers=("NCH", "OIH", "NCH"))
        y = y + b[None, :, None]
        y = jnp.maximum(y, 0.0)
        mean = jnp.mean(y, axis=(0, 2), keepdims=True)
        var = jnp.mean((y - mean) ** 2, axis=(0, 2), keepdims=True)
        y = (y - mean) / jnp.sqrt(var + EPS)
        return y * g[None, :, None] + be[None, :, None]

    h = layer(x, w1, b1, g1, be1)
    return layer(h, w2, b2, g2, be2)


if __name__ == "__main__":
    key = jax.random.PRNGKey(0)
    k1, k2, k3, k4, kx, kx2 = jax.random.split(key, 6)

    batch, in_ch, out_ch, length = 2, 4, 8, 16

    # Deterministic parameter init (shapes from Conv_block1D.__init__).
    w1 = jax.random.normal(k1, (out_ch, in_ch, 3), jnp.float32) * 0.2
    b1 = jax.random.normal(k2, (out_ch,), jnp.float32) * 0.1
    w2 = jax.random.normal(k3, (out_ch, out_ch, 3), jnp.float32) * 0.2
    b2 = jax.random.normal(k4, (out_ch,), jnp.float32) * 0.1
    # BatchNorm1d default init: weight = 1, bias = 0.
    g1 = jnp.ones((out_ch,), jnp.float32)
    be1 = jnp.zeros((out_ch,), jnp.float32)
    g2 = jnp.ones((out_ch,), jnp.float32)
    be2 = jnp.zeros((out_ch,), jnp.float32)

    fwd = jax.jit(conv_block1d, static_argnames=("tile",))

    # Check 1: module-sized input (single tile per sequence).
    x = jax.random.normal(kx, (batch, in_ch, length), jnp.float32)
    out = jax.block_until_ready(fwd(x, w1, b1, w2, b2, g1, be1, g2, be2))
    ref = jax.block_until_ready(
        reference_forward(x, w1, b1, w2, b2, g1, be1, g2, be2))
    assert out.shape == (batch, out_ch, length), out.shape
    if not jnp.allclose(out, ref, atol=1e-3, rtol=1e-3):
        raise AssertionError(
            f"mismatch (single tile), max abs err = {float(jnp.max(jnp.abs(out - ref)))}")

    # Check 2: multi-tile path (lane-tiled grid + halo exchange across tiles).
    length2 = 256
    x2 = jax.random.normal(kx2, (batch, in_ch, length2), jnp.float32)
    out2 = jax.block_until_ready(fwd(x2, w1, b1, w2, b2, g1, be1, g2, be2, tile=128))
    ref2 = jax.block_until_ready(
        reference_forward(x2, w1, b1, w2, b2, g1, be1, g2, be2))
    assert out2.shape == (batch, out_ch, length2), out2.shape
    if not jnp.allclose(out2, ref2, atol=1e-3, rtol=1e-3):
        raise AssertionError(
            f"mismatch (multi tile), max abs err = {float(jnp.max(jnp.abs(out2 - ref2)))}")

    print("KERNEL_OK")
</pallas_src>

<mosaic_0001>
module attributes {stable_mosaic.version = 11 : i64} {
  func.func @_conv_relu_stats_kernel(%arg0: i32, %arg1: i32, %arg2: memref<1x4x16xf32, #tpu.memory_space<vmem>>, %arg3: memref<1x4x1xf32, #tpu.memory_space<vmem>>, %arg4: memref<1x4x1xf32, #tpu.memory_space<vmem>>, %arg5: memref<3x8x4xf32, #tpu.memory_space<vmem>>, %arg6: memref<8x1xf32, #tpu.memory_space<vmem>>, %arg7: memref<4x2xf32, #tpu.memory_space<vmem>>, %arg8: memref<1x8x16xf32, #tpu.memory_space<vmem>>, %arg9: memref<8x128xf32, #tpu.memory_space<vmem>>) attributes {dimension_semantics = [#tpu.dimension_semantics<arbitrary>, #tpu.dimension_semantics<arbitrary>], iteration_bounds = array<i64: 2, 1>, scalar_prefetch = 0 : i64, scratch_operands = 0 : i64, tpu.core_type = #tpu.core_type<tc>, window_params = [{transform_indices = @transform_0, window_bounds = array<i64: 1, 4, 16>}, {transform_indices = @transform_1, window_bounds = array<i64: 1, 4, 1>}, {transform_indices = @transform_2, window_bounds = array<i64: 1, 4, 1>}, {pipeline_mode = #tpu.pipeline_mode<synchronous>, transform_indices = @transform_3, window_bounds = array<i64: 3, 8, 4>}, {pipeline_mode = #tpu.pipeline_mode<synchronous>, transform_indices = @transform_4, window_bounds = array<i64: 8, 1>}, {pipeline_mode = #tpu.pipeline_mode<synchronous>, transform_indices = @transform_5, window_bounds = array<i64: 4, 2>}, {transform_indices = @transform_6, window_bounds = array<i64: 1, 8, 16>}, {pipeline_mode = #tpu.pipeline_mode<synchronous>, transform_indices = @transform_7, window_bounds = array<i64: 8, 128>}]} {
    %c0_i32 = arith.constant 0 : i32
    %0 = arith.cmpi eq, %arg0, %c0_i32 : i32
    %c0_i32_0 = arith.constant 0 : i32
    %1 = arith.cmpi eq, %arg1, %c0_i32_0 : i32
    %2 = arith.andi %0, %1 : i1
    %3 = arith.extui %2 : i1 to i32
    %c0_i32_1 = arith.constant 0 : i32
    %4 = arith.cmpi ne, %3, %c0_i32_1 : i32
    scf.if %4 {
      %cst_35 = arith.constant 0.000000e+00 : f32
      %45 = vector.broadcast %cst_35 : f32 to vector<8x128xf32>
      %c0_36 = arith.constant 0 : index
      %c0_37 = arith.constant 0 : index
      %46 = vector.load %arg9[%c0_36, %c0_37] : memref<8x128xf32, #tpu.memory_space<vmem>>, vector<8x128xf32>
      tpu.vector_store %arg9[%c0_36, %c0_37], %45 {strides = array<i32>} : memref<8x128xf32, #tpu.memory_space<vmem>>, vector<8x128xf32>,
    } else {
    }
    %c0 = arith.constant 0 : index
    %c0_2 = arith.constant 0 : index
    %c0_3 = arith.constant 0 : index
    %5 = vector.load %arg2[%c0, %c0_2, %c0_3] : memref<1x4x16xf32, #tpu.memory_space<vmem>>, vector<1x4x16xf32>
    %6 = vector.shape_cast %5 : vector<1x4x16xf32> to vector<4x16xf32>
    %c0_4 = arith.constant 0 : index
    %c0_5 = arith.constant 0 : index
    %c0_6 = arith.constant 0 : index
    %7 = vector.load %arg3[%c0_4, %c0_5, %c0_6] : memref<1x4x1xf32, #tpu.memory_space<vmem>>, vector<1x4x1xf32>
    %8 = vector.shape_cast %7 : vector<1x4x1xf32> to vector<4x1xf32>
    %c0_7 = arith.constant 0 : index
    %c0_8 = arith.constant 0 : index
    %c0_9 = arith.constant 0 : index
    %9 = vector.load %arg4[%c0_7, %c0_8, %c0_9] : memref<1x4x1xf32, #tpu.memory_space<vmem>>, vector<1x4x1xf32>
    %10 = vector.shape_cast %9 : vector<1x4x1xf32> to vector<4x1xf32>
    %11 = vector.extract_strided_slice %6 {offsets = [0, 0], sizes = [4, 15], strides = [1, 1]} : vector<4x16xf32> to vector<4x15xf32>
    %12 = tpu.concatenate %8, %11 in 1 : vector<4x1xf32>, vector<4x15xf32> -> vector<4x16xf32>
    %13 = vector.extract_strided_slice %6 {offsets = [0, 1], sizes = [4, 15], strides = [1, 1]} : vector<4x16xf32> to vector<4x15xf32>
    %14 = tpu.concatenate %13, %10 in 1 : vector<4x15xf32>, vector<4x1xf32> -> vector<4x16xf32>
    %c0_10 = arith.constant 0 : index
    %c0_11 = arith.constant 0 : index
    %c0_12 = arith.constant 0 : index
    %15 = vector.load %arg5[%c0_10, %c0_11, %c0_12] : memref<3x8x4xf32, #tpu.memory_space<vmem>>, vector<1x8x4xf32>
    %16 = vector.shape_cast %15 : vector<1x8x4xf32> to vector<8x4xf32>
    %cst = arith.constant dense<0.000000e+00> : vector<8x16xf32>
    %17 = tpu.matmul %16, %12, %cst {dimension_numbers = #tpu.dot_dimension_numbers<[1], [0], [0], [1], [0, 0, 1, 1], [], []>} : vector<8x4xf32>, vector<4x16xf32>, vector<8x16xf32> -> vector<8x16xf32>
    %c1 = arith.constant 1 : index
    %c0_13 = arith.constant 0 : index
    %c0_14 = arith.constant 0 : index
    %18 = vector.load %arg5[%c1, %c0_13, %c0_14] : memref<3x8x4xf32, #tpu.memory_space<vmem>>, vector<1x8x4xf32>
    %19 = vector.shape_cast %18 : vector<1x8x4xf32> to vector<8x4xf32>
    %cst_15 = arith.constant dense<0.000000e+00> : vector<8x16xf32>
    %20 = tpu.matmul %19, %6, %cst_15 {dimension_numbers = #tpu.dot_dimension_numbers<[1], [0], [0], [1], [0, 0, 1, 1], [], []>} : vector<8x4xf32>, vector<4x16xf32>, vector<8x16xf32> -> vector<8x16xf32>
    %21 = arith.addf %17, %20 : vector<8x16xf32>
    %c2 = arith.constant 2 : index
    %c0_16 = arith.constant 0 : index
    %c0_17 = arith.constant 0 : index
    %22 = vector.load %arg5[%c2, %c0_16, %c0_17] : memref<3x8x4xf32, #tpu.memory_space<vmem>>, vector<1x8x4xf32>
    %23 = vector.shape_cast %22 : vector<1x8x4xf32> to vector<8x4xf32>
    %cst_18 = arith.constant dense<0.000000e+00> : vector<8x16xf32>
    %24 = tpu.matmul %23, %14, %cst_18 {dimension_numbers = #tpu.dot_dimension_numbers<[1], [0], [0], [1], [0, 0, 1, 1], [], []>} : vector<8x4xf32>, vector<4x16xf32>, vector<8x16xf32> -> vector<8x16xf32>
    %25 = arith.addf %21, %24 : vector<8x16xf32>
    %c0_19 = arith.constant 0 : index
    %c0_20 = arith.constant 0 : index
    %26 = vector.load %arg6[%c0_19, %c0_20] : memref<8x1xf32, #tpu.memory_space<vmem>>, vector<8x1xf32>
    %27 = vector.broadcast %26 : vector<8x1xf32> to vector<8x16xf32>
    %28 = arith.addf %25, %27 : vector<8x16xf32>
    %cst_21 = arith.constant 0.000000e+00 : f32
    %29 = vector.broadcast %cst_21 : f32 to vector<8x16xf32>
    %30 = arith.maximumf %28, %29 : vector<8x16xf32>
    %c0_22 = arith.constant 0 : index
    %c0_23 = arith.constant 0 : index
    %c0_24 = arith.constant 0 : index
    %31 = vector.load %arg8[%c0_22, %c0_23, %c0_24] : memref<1x8x16xf32, #tpu.memory_space<vmem>>, vector<1x8x16xf32>
    %32 = vector.shape_cast %31 : vector<1x8x16xf32> to vector<8x16xf32>
    %33 = vector.shape_cast %30 : vector<8x16xf32> to vector<1x8x16xf32>
    tpu.vector_store %arg8[%c0_22, %c0_23, %c0_24], %33 {strides = array<i32>} : memref<1x8x16xf32, #tpu.memory_space<vmem>>, vector<1x8x16xf32>,
    %c0_25 = arith.constant 0 : index
    %c0_26 = arith.constant 0 : index
    %34 = vector.load %arg9[%c0_25, %c0_26] : memref<8x128xf32, #tpu.memory_space<vmem>>, vector<8x1xf32>
    %cst_27 = arith.constant dense<0.000000e+00> : vector<8xf32>
    %35 = vector.multi_reduction <add>, %30, %cst_27 [1] : vector<8x16xf32> to vector<8xf32>
    %36 = vector.shape_cast %35 : vector<8xf32> to vector<8x1xf32>
    %37 = arith.addf %34, %36 : vector<8x1xf32>
    %c0_28 = arith.constant 0 : index
    %c0_29 = arith.constant 0 : index
    %38 = vector.load %arg9[%c0_28, %c0_29] : memref<8x128xf32, #tpu.memory_space<vmem>>, vector<8x1xf32>
    tpu.vector_store %arg9[%c0_28, %c0_29], %37 {strides = array<i32>} : memref<8x128xf32, #tpu.memory_space<vmem>>, vector<8x1xf32>,
    %c0_30 = arith.constant 0 : index
    %c1_31 = arith.constant 1 : index
    %39 = vector.load %arg9[%c0_30, %c1_31] : memref<8x128xf32, #tpu.memory_space<vmem>>, vector<8x1xf32>
    %40 = arith.mulf %30, %30 : vector<8x16xf32>
    %cst_32 = arith.constant dense<0.000000e+00> : vector<8xf32>
    %41 = vector.multi_reduction <add>, %40, %cst_32 [1] : vector<8x16xf32> to vector<8xf32>
    %42 = vector.shape_cast %41 : vector<8xf32> to vector<8x1xf32>
    %43 = arith.addf %39, %42 : vector<8x1xf32>
    %c0_33 = arith.constant 0 : index
    %c1_34 = arith.constant 1 : index
    %44 = vector.load %arg9[%c0_33, %c1_34] : memref<8x128xf32, #tpu.memory_space<vmem>>, vector<8x1xf32>
    tpu.vector_store %arg9[%c0_33, %c1_34], %43 {strides = array<i32>} : memref<8x128xf32, #tpu.memory_space<vmem>>, vector<8x1xf32>,
    return
  }
  func.func @transform_0(%arg0: i32, %arg1: i32) -> (i32, i32, i32) {
    %c0_i32 = arith.constant 0 : i32
    %c0_i32_0 = arith.constant 0 : i32
    return %arg0, %c0_i32, %arg1 : i32, i32, i32
  }
  func.func @transform_1(%arg0: i32, %arg1: i32) -> (i32, i32, i32) {
    %c1_i32 = arith.constant 1 : i32
    %0 = arith.muli %arg0, %c1_i32 : i32
    %1 = arith.addi %0, %arg1 : i32
    %c0_i32 = arith.constant 0 : i32
    %c0_i32_0 = arith.constant 0 : i32
    %c0_i32_1 = arith.constant 0 : i32
    return %1, %c0_i32, %c0_i32_0 : i32, i32, i32
  }
  func.func @transform_2(%arg0: i32, %arg1: i32) -> (i32, i32, i32) {
    %c1_i32 = arith.constant 1 : i32
    %0 = arith.muli %arg0, %c1_i32 : i32
    %1 = arith.addi %0, %arg1 : i32
    %c0_i32 = arith.constant 0 : i32
    %c0_i32_0 = arith.constant 0 : i32
    %c0_i32_1 = arith.constant 0 : i32
    return %1, %c0_i32, %c0_i32_0 : i32, i32, i32
  }
  func.func @transform_3(%arg0: i32, %arg1: i32) -> (i32, i32, i32) {
    %c0_i32 = arith.constant 0 : i32
    %c0_i32_0 = arith.constant 0 : i32
    %c0_i32_1 = arith.constant 0 : i32
    %c0_i32_2 = arith.constant 0 : i32
    return %c0_i32, %c0_i32_0, %c0_i32_1 : i32, i32, i32
  }
  func.func @transform_4(%arg0: i32, %arg1: i32) -> (i32, i32) {
    %c0_i32 = arith.constant 0 : i32
    %c0_i32_0 = arith.constant 0 : i32
    %c0_i32_1 = arith.constant 0 : i32
    return %c0_i32, %c0_i32_0 : i32, i32
  }
  func.func @transform_5(%arg0: i32, %arg1: i32) -> (i32, i32) {
    %c0_i32 = arith.constant 0 : i32
    %c0_i32_0 = arith.constant 0 : i32
    %c0_i32_1 = arith.constant 0 : i32
    return %c0_i32, %c0_i32_0 : i32, i32
  }
  func.func @transform_6(%arg0: i32, %arg1: i32) -> (i32, i32, i32) {
    %c0_i32 = arith.constant 0 : i32
    %c0_i32_0 = arith.constant 0 : i32
    return %arg0, %c0_i32, %arg1 : i32, i32, i32
  }
  func.func @transform_7(%arg0: i32, %arg1: i32) -> (i32, i32) {
    %c0_i32 = arith.constant 0 : i32
    %c0_i32_0 = arith.constant 0 : i32
    %c0_i32_1 = arith.constant 0 : i32
    return %c0_i32, %c0_i32_0 : i32, i32
  }
}

module attributes {stable_mosaic.version = 11 : i64} {
  func.func @_bn_apply_kernel(%arg0: i32, %arg1: i32, %arg2: memref<1x8x16xf32, #tpu.memory_space<vmem>>, %arg3: memref<8x2xf32, #tpu.memory_space<vmem>>, %arg4: memref<1x8x16xf32, #tpu.memory_space<vmem>>) attributes {dimension_semantics = [#tpu.dimension_semantics<parallel>, #tpu.dimension_semantics<parallel>], iteration_bounds = array<i64: 2, 1>, scalar_prefetch = 0 : i64, scratch_operands = 0 : i64, tpu.core_type = #tpu.core_type<tc>, window_params = [{transform_indices = @transform_0, window_bounds = array<i64: 1, 8, 16>}, {pipeline_mode = #tpu.pipeline_mode<synchronous>, transform_indices = @transform_1, window_bounds = array<i64: 8, 2>}, {transform_indices = @transform_2, window_bounds = array<i64: 1, 8, 16>}]} {
    %c0 = arith.constant 0 : index
    %c0_0 = arith.constant 0 : index
    %c0_1 = arith.constant 0 : index
    %0 = vector.load %arg2[%c0, %c0_0, %c0_1] : memref<1x8x16xf32, #tpu.memory_space<vmem>>, vector<1x8x16xf32>
    %1 = vector.shape_cast %0 : vector<1x8x16xf32> to vector<8x16xf32>
    %c0_2 = arith.constant 0 : index
    %c0_3 = arith.constant 0 : index
    %2 = vector.load %arg3[%c0_2, %c0_3] : memref<8x2xf32, #tpu.memory_space<vmem>>, vector<8x1xf32>
    %3 = vector.broadcast %2 : vector<8x1xf32> to vector<8x16xf32>
    %4 = arith.mulf %1, %3 : vector<8x16xf32>
    %c0_4 = arith.constant 0 : index
    %c1 = arith.constant 1 : index
    %5 = vector.load %arg3[%c0_4, %c1] : memref<8x2xf32, #tpu.memory_space<vmem>>, vector<8x1xf32>
    %6 = vector.broadcast %5 : vector<8x1xf32> to vector<8x16xf32>
    %7 = arith.addf %4, %6 : vector<8x16xf32>
    %c0_5 = arith.constant 0 : index
    %c0_6 = arith.constant 0 : index
    %c0_7 = arith.constant 0 : index
    %8 = vector.load %arg4[%c0_5, %c0_6, %c0_7] : memref<1x8x16xf32, #tpu.memory_space<vmem>>, vector<1x8x16xf32>
    %9 = vector.shape_cast %8 : vector<1x8x16xf32> to vector<8x16xf32>
    %10 = vector.shape_cast %7 : vector<8x16xf32> to vector<1x8x16xf32>
    tpu.vector_store %arg4[%c0_5, %c0_6, %c0_7], %10 {strides = array<i32>} : memref<1x8x16xf32, #tpu.memory_space<vmem>>, vector<1x8x16xf32>,
    return
  }
  func.func @transform_0(%arg0: i32, %arg1: i32) -> (i32, i32, i32) {
    %c0_i32 = arith.constant 0 : i32
    %c0_i32_0 = arith.constant 0 : i32
    return %arg0, %c0_i32, %arg1 : i32, i32, i32
  }
  func.func @transform_1(%arg0: i32, %arg1: i32) -> (i32, i32) {
    %c0_i32 = arith.constant 0 : i32
    %c0_i32_0 = arith.constant 0 : i32
    %c0_i32_1 = arith.constant 0 : i32
    return %c0_i32, %c0_i32_0 : i32, i32
  }
  func.func @transform_2(%arg0: i32, %arg1: i32) -> (i32, i32, i32) {
    %c0_i32 = arith.constant 0 : i32
    %c0_i32_0 = arith.constant 0 : i32
    return %arg0, %c0_i32, %arg1 : i32, i32, i32
  }
}

module attributes {stable_mosaic.version = 11 : i64} {
  func.func @_conv_relu_stats_kernel(%arg0: i32, %arg1: i32, %arg2: memref<1x8x16xf32, #tpu.memory_space<vmem>>, %arg3: memref<1x8x1xf32, #tpu.memory_space<vmem>>, %arg4: memref<1x8x1xf32, #tpu.memory_space<vmem>>, %arg5: memref<3x8x8xf32, #tpu.memory_space<vmem>>, %arg6: memref<8x1xf32, #tpu.memory_space<vmem>>, %arg7: memref<8x2xf32, #tpu.memory_space<vmem>>, %arg8: memref<1x8x16xf32, #tpu.memory_space<vmem>>, %arg9: memref<8x128xf32, #tpu.memory_space<vmem>>) attributes {dimension_semantics = [#tpu.dimension_semantics<arbitrary>, #tpu.dimension_semantics<arbitrary>], iteration_bounds = array<i64: 2, 1>, scalar_prefetch = 0 : i64, scratch_operands = 0 : i64, tpu.core_type = #tpu.core_type<tc>, window_params = [{transform_indices = @transform_0, window_bounds = array<i64: 1, 8, 16>}, {transform_indices = @transform_1, window_bounds = array<i64: 1, 8, 1>}, {transform_indices = @transform_2, window_bounds = array<i64: 1, 8, 1>}, {pipeline_mode = #tpu.pipeline_mode<synchronous>, transform_indices = @transform_3, window_bounds = array<i64: 3, 8, 8>}, {pipeline_mode = #tpu.pipeline_mode<synchronous>, transform_indices = @transform_4, window_bounds = array<i64: 8, 1>}, {pipeline_mode = #tpu.pipeline_mode<synchronous>, transform_indices = @transform_5, window_bounds = array<i64: 8, 2>}, {transform_indices = @transform_6, window_bounds = array<i64: 1, 8, 16>}, {pipeline_mode = #tpu.pipeline_mode<synchronous>, transform_indices = @transform_7, window_bounds = array<i64: 8, 128>}]} {
    %c0_i32 = arith.constant 0 : i32
    %0 = arith.cmpi eq, %arg0, %c0_i32 : i32
    %c0_i32_0 = arith.constant 0 : i32
    %1 = arith.cmpi eq, %arg1, %c0_i32_0 : i32
    %2 = arith.andi %0, %1 : i1
    %3 = arith.extui %2 : i1 to i32
    %c0_i32_1 = arith.constant 0 : i32
    %4 = arith.cmpi ne, %3, %c0_i32_1 : i32
    scf.if %4 {
      %cst_39 = arith.constant 0.000000e+00 : f32
      %51 = vector.broadcast %cst_39 : f32 to vector<8x128xf32>
      %c0_40 = arith.constant 0 : index
      %c0_41 = arith.constant 0 : index
      %52 = vector.load %arg9[%c0_40, %c0_41] : memref<8x128xf32, #tpu.memory_space<vmem>>, vector<8x128xf32>
      tpu.vector_store %arg9[%c0_40, %c0_41], %51 {strides = array<i32>} : memref<8x128xf32, #tpu.memory_space<vmem>>, vector<8x128xf32>,
    } else {
    }
    %c0 = arith.constant 0 : index
    %c0_2 = arith.constant 0 : index
    %c0_3 = arith.constant 0 : index
    %5 = vector.load %arg2[%c0, %c0_2, %c0_3] : memref<1x8x16xf32, #tpu.memory_space<vmem>>, vector<1x8x16xf32>
    %6 = vector.shape_cast %5 : vector<1x8x16xf32> to vector<8x16xf32>
    %c0_4 = arith.constant 0 : index
    %c0_5 = arith.constant 0 : index
    %c0_6 = arith.constant 0 : index
    %7 = vector.load %arg3[%c0_4, %c0_5, %c0_6] : memref<1x8x1xf32, #tpu.memory_space<vmem>>, vector<1x8x1xf32>
    %8 = vector.shape_cast %7 : vector<1x8x1xf32> to vector<8x1xf32>
    %c0_7 = arith.constant 0 : index
    %c0_8 = arith.constant 0 : index
    %c0_9 = arith.constant 0 : index
    %9 = vector.load %arg4[%c0_7, %c0_8, %c0_9] : memref<1x8x1xf32, #tpu.memory_space<vmem>>, vector<1x8x1xf32>
    %10 = vector.shape_cast %9 : vector<1x8x1xf32> to vector<8x1xf32>
    %c0_10 = arith.constant 0 : index
    %c0_11 = arith.constant 0 : index
    %11 = vector.load %arg7[%c0_10, %c0_11] : memref<8x2xf32, #tpu.memory_space<vmem>>, vector<8x1xf32>
    %12 = vector.broadcast %11 : vector<8x1xf32> to vector<8x16xf32>
    %13 = arith.mulf %6, %12 : vector<8x16xf32>
    %c0_12 = arith.constant 0 : index
    %c1 = arith.constant 1 : index
    %14 = vector.load %arg7[%c0_12, %c1] : memref<8x2xf32, #tpu.memory_space<vmem>>, vector<8x1xf32>
    %15 = vector.broadcast %14 : vector<8x1xf32> to vector<8x16xf32>
    %16 = arith.addf %13, %15 : vector<8x16xf32>
    %17 = vector.extract_strided_slice %16 {offsets = [0, 0], sizes = [8, 15], strides = [1, 1]} : vector<8x16xf32> to vector<8x15xf32>
    %18 = tpu.concatenate %8, %17 in 1 : vector<8x1xf32>, vector<8x15xf32> -> vector<8x16xf32>
    %19 = vector.extract_strided_slice %16 {offsets = [0, 1], sizes = [8, 15], strides = [1, 1]} : vector<8x16xf32> to vector<8x15xf32>
    %20 = tpu.concatenate %19, %10 in 1 : vector<8x15xf32>, vector<8x1xf32> -> vector<8x16xf32>
    %c0_13 = arith.constant 0 : index
    %c0_14 = arith.constant 0 : index
    %c0_15 = arith.constant 0 : index
    %21 = vector.load %arg5[%c0_13, %c0_14, %c0_15] : memref<3x8x8xf32, #tpu.memory_space<vmem>>, vector<1x8x8xf32>
    %22 = vector.shape_cast %21 : vector<1x8x8xf32> to vector<8x8xf32>
    %cst = arith.constant dense<0.000000e+00> : vector<8x16xf32>
    %23 = tpu.matmul %22, %18, %cst {dimension_numbers = #tpu.dot_dimension_numbers<[1], [0], [0], [1], [0, 0, 1, 1], [], []>} : vector<8x8xf32>, vector<8x16xf32>, vector<8x16xf32> -> vector<8x16xf32>
    %c1_16 = arith.constant 1 : index
    %c0_17 = arith.constant 0 : index
    %c0_18 = arith.constant 0 : index
    %24 = vector.load %arg5[%c1_16, %c0_17, %c0_18] : memref<3x8x8xf32, #tpu.memory_space<vmem>>, vector<1x8x8xf32>
    %25 = vector.shape_cast %24 : vector<1x8x8xf32> to vector<8x8xf32>
    %cst_19 = arith.constant dense<0.000000e+00> : vector<8x16xf32>
    %26 = tpu.matmul %25, %16, %cst_19 {dimension_numbers = #tpu.dot_dimension_numbers<[1], [0], [0], [1], [0, 0, 1, 1], [], []>} : vector<8x8xf32>, vector<8x16xf32>, vector<8x16xf32> -> vector<8x16xf32>
    %27 = arith.addf %23, %26 : vector<8x16xf32>
    %c2 = arith.constant 2 : index
    %c0_20 = arith.constant 0 : index
    %c0_21 = arith.constant 0 : index
    %28 = vector.load %arg5[%c2, %c0_20, %c0_21] : memref<3x8x8xf32, #tpu.memory_space<vmem>>, vector<1x8x8xf32>
    %29 = vector.shape_cast %28 : vector<1x8x8xf32> to vector<8x8xf32>
    %cst_22 = arith.constant dense<0.000000e+00> : vector<8x16xf32>
    %30 = tpu.matmul %29, %20, %cst_22 {dimension_numbers = #tpu.dot_dimension_numbers<[1], [0], [0], [1], [0, 0, 1, 1], [], []>} : vector<8x8xf32>, vector<8x16xf32>, vector<8x16xf32> -> vector<8x16xf32>
    %31 = arith.addf %27, %30 : vector<8x16xf32>
    %c0_23 = arith.constant 0 : index
    %c0_24 = arith.constant 0 : index
    %32 = vector.load %arg6[%c0_23, %c0_24] : memref<8x1xf32, #tpu.memory_space<vmem>>, vector<8x1xf32>
    %33 = vector.broadcast %32 : vector<8x1xf32> to vector<8x16xf32>
    %34 = arith.addf %31, %33 : vector<8x16xf32>
    %cst_25 = arith.constant 0.000000e+00 : f32
    %35 = vector.broadcast %cst_25 : f32 to vector<8x16xf32>
    %36 = arith.maximumf %34, %35 : vector<8x16xf32>
    %c0_26 = arith.constant 0 : index
    %c0_27 = arith.constant 0 : index
    %c0_28 = arith.constant 0 : index
    %37 = vector.load %arg8[%c0_26, %c0_27, %c0_28] : memref<1x8x16xf32, #tpu.memory_space<vmem>>, vector<1x8x16xf32>
    %38 = vector.shape_cast %37 : vector<1x8x16xf32> to vector<8x16xf32>
    %39 = vector.shape_cast %36 : vector<8x16xf32> to vector<1x8x16xf32>
    tpu.vector_store %arg8[%c0_26, %c0_27, %c0_28], %39 {strides = array<i32>} : memref<1x8x16xf32, #tpu.memory_space<vmem>>, vector<1x8x16xf32>,
    %c0_29 = arith.constant 0 : index
    %c0_30 = arith.constant 0 : index
    %40 = vector.load %arg9[%c0_29, %c0_30] : memref<8x128xf32, #tpu.memory_space<vmem>>, vector<8x1xf32>
    %cst_31 = arith.constant dense<0.000000e+00> : vector<8xf32>
    %41 = vector.multi_reduction <add>, %36, %cst_31 [1] : vector<8x16xf32> to vector<8xf32>
    %42 = vector.shape_cast %41 : vector<8xf32> to vector<8x1xf32>
    %43 = arith.addf %40, %42 : vector<8x1xf32>
    %c0_32 = arith.constant 0 : index
    %c0_33 = arith.constant 0 : index
    %44 = vector.load %arg9[%c0_32, %c0_33] : memref<8x128xf32, #tpu.memory_space<vmem>>, vector<8x1xf32>
    tpu.vector_store %arg9[%c0_32, %c0_33], %43 {strides = array<i32>} : memref<8x128xf32, #tpu.memory_space<vmem>>, vector<8x1xf32>,
    %c0_34 = arith.constant 0 : index
    %c1_35 = arith.constant 1 : index
    %45 = vector.load %arg9[%c0_34, %c1_35] : memref<8x128xf32, #tpu.memory_space<vmem>>, vector<8x1xf32>
    %46 = arith.mulf %36, %36 : vector<8x16xf32>
    %cst_36 = arith.constant dense<0.000000e+00> : vector<8xf32>
    %47 = vector.multi_reduction <add>, %46, %cst_36 [1] : vector<8x16xf32> to vector<8xf32>
    %48 = vector.shape_cast %47 : vector<8xf32> to vector<8x1xf32>
    %49 = arith.addf %45, %48 : vector<8x1xf32>
    %c0_37 = arith.constant 0 : index
    %c1_38 = arith.constant 1 : index
    %50 = vector.load %arg9[%c0_37, %c1_38] : memref<8x128xf32, #tpu.memory_space<vmem>>, vector<8x1xf32>
    tpu.vector_store %arg9[%c0_37, %c1_38], %49 {strides = array<i32>} : memref<8x128xf32, #tpu.memory_space<vmem>>, vector<8x1xf32>,
    return
  }
  func.func @transform_0(%arg0: i32, %arg1: i32) -> (i32, i32, i32) {
    %c0_i32 = arith.constant 0 : i32
    %c0_i32_0 = arith.constant 0 : i32
    return %arg0, %c0_i32, %arg1 : i32, i32, i32
  }
  func.func @transform_1(%arg0: i32, %arg1: i32) -> (i32, i32, i32) {
    %c1_i32 = arith.constant 1 : i32
    %0 = arith.muli %arg0, %c1_i32 : i32
    %1 = arith.addi %0, %arg1 : i32
    %c0_i32 = arith.constant 0 : i32
    %c0_i32_0 = arith.constant 0 : i32
    %c0_i32_1 = arith.constant 0 : i32
    return %1, %c0_i32, %c0_i32_0 : i32, i32, i32
  }
  func.func @transform_2(%arg0: i32, %arg1: i32) -> (i32, i32, i32) {
    %c1_i32 = arith.constant 1 : i32
    %0 = arith.muli %arg0, %c1_i32 : i32
    %1 = arith.addi %0, %arg1 : i32
    %c0_i32 = arith.constant 0 : i32
    %c0_i32_0 = arith.constant 0 : i32
    %c0_i32_1 = arith.constant 0 : i32
    return %1, %c0_i32, %c0_i32_0 : i32, i32, i32
  }
  func.func @transform_3(%arg0: i32, %arg1: i32) -> (i32, i32, i32) {
    %c0_i32 = arith.constant 0 : i32
    %c0_i32_0 = arith.constant 0 : i32
    %c0_i32_1 = arith.constant 0 : i32
    %c0_i32_2 = arith.constant 0 : i32
    return %c0_i32, %c0_i32_0, %c0_i32_1 : i32, i32, i32
  }
  func.func @transform_4(%arg0: i32, %arg1: i32) -> (i32, i32) {
    %c0_i32 = arith.constant 0 : i32
    %c0_i32_0 = arith.constant 0 : i32
    %c0_i32_1 = arith.constant 0 : i32
    return %c0_i32, %c0_i32_0 : i32, i32
  }
  func.func @transform_5(%arg0: i32, %arg1: i32) -> (i32, i32) {
    %c0_i32 = arith.constant 0 : i32
    %c0_i32_0 = arith.constant 0 : i32
    %c0_i32_1 = arith.constant 0 : i32
    return %c0_i32, %c0_i32_0 : i32, i32
  }
  func.func @transform_6(%arg0: i32, %arg1: i32) -> (i32, i32, i32) {
    %c0_i32 = arith.constant 0 : i32
    %c0_i32_0 = arith.constant 0 : i32
    return %arg0, %c0_i32, %arg1 : i32, i32, i32
  }
  func.func @transform_7(%arg0: i32, %arg1: i32) -> (i32, i32) {
    %c0_i32 = arith.constant 0 : i32
    %c0_i32_0 = arith.constant 0 : i32
    %c0_i32_1 = arith.constant 0 : i32
    return %c0_i32, %c0_i32_0 : i32, i32
  }
}

</mosaic_0001>

<bundles_post_ra>
// kernel: conv_block1d.5
= control target key start
LH: loop header
LB: loop body
LE: loop exit
PB: predicated region body
PF: predicated region fallthrough
CT: control target
= control target key end

     0   :  { %7 = vsyncpa [#allocation3], 0  ;;  %s548_s0 = inlined_call_operand.vmem [shape: f32[2,8,16], index: 0, kind: input, shape index: {}]   ;;  %s549_s1 = inlined_call_operand.vmem [shape: f32[8,2], index: 1, kind: input, shape index: {}]   ;;  %s550_s2 = inlined_call_operand.hbm [shape: f32[2,8,16], index: 2, kind: output, shape index: {}]  }
   0x1   :  { %9 = vsyncpa [#allocation3 + $0x1], 0  ;;  %s433_s9 = smov 0   ;;  %s435_s10 = smov 0  }
   0x2   :  { %s437_s11 = smov 0   ;;  %s439_s12 = smov 0  }
   0x3   :  { %s441_s13 = smov 0   ;;  %s443_s14 = smov 0  }
   0x4 LB: > { %s265_s15 = sadd.s32 4294967295, %s413_s14   ;;  %s266_s16 = sadd.s32 4294967294, %s413_s14   ;;  %s413_s14 = sphi %s443_s14, %s15_s14   ;;  %s409_s13 = sphi %s441_s13, %s557_s13   ;;  %s405_s12 = sphi %s439_s12, %s556_s12   ;;  %s401_s11 = sphi %s437_s11, %s555_s11   ;;  %s397_s10 = sphi %s435_s10, %s554_s10   ;;  %s393_s9 = sphi %s433_s9, %s553_s9  }
   0x5   : > { %s27_s17 = sadd.s32 1, %s409_s13  ;;  %s85_s18 = sadd.s32 1, %s401_s11 }
   0x6   : > { %p29_p0 = scmp.ge.s32.totalorder %s27_s17, 2  ;;  %p95_p1 = scmp.ne.s32.totalorder %s401_s11, %s397_s10 }
   0x7   : > { %p96_p2 = scmp.eq.s32.totalorder %s265_s15, 1  ;;  %p101_p3 = scmp.ne.s32.totalorder %s397_s10, %s393_s9 }
   0x8   : > { %s559_s17 = smov (%p29_p0, %s27_s17), 0  ;;  %p102_p5 = scmp.eq.s32.totalorder %s266_s16, 1 }
   0x9   : > { %p473_p4 = por %p96_p2, %p95_p1  ;;  %s80_s20 = ssub.s32 %s409_s13, %s559_s17 }
   0xa   : > { %p269_p6 = scmp.ge.s32.totalorder %s413_s14, 1  ;;  %p83_p7 = scmp.eq.s32.totalorder %s80_s20, 0 }
   0xb   : > { %p480_p8 = por %p102_p5, %p101_p3  ;;  %p133_p9 = scmp.lt.s32.totalorder %s413_s14, 3 }
   0xc   : > { %s486_s22 = scalar_select %p83_p7, %s401_s11, %s85_s18  }
   0xd   : > { %p134_p10 = pnand %p269_p6, %p133_p9 }
   0xe   : > { %v165_v0 = vld [vmem:[%s549_s1] sm:$0xff] (!%p134_p10)  ;;  %v415_v1 = vmov (!%p134_p10), 0   ;;  %v416_v2 = vmov (!%p134_p10), 1   ;;  %p157_p11 = scmp.lt.s32.totalorder (!%p134_p10), %s405_s12, 1  ;;  %s154_s26 = sand.u32 (!%p134_p10), 1, %s397_s10   ;;  %vm177_vm0 = vcmask (!%p134_p10), 130048  }
   0xf   : > { %137 = sbr.rel (%p134_p10) target bundleno = 165 (0xa5), region = 28  ;;  %333 = vset.pattern.permute.xlu0 (!%p134_p10), %v415_v1  ;;  %s270_s28 = sshll.u32 (!%p134_p10), %s154_s26, 3 }
  0x10   : > { %168 = vperm.xlu0 (!%p134_p10), %333, %v165_v0   ;;  %s273_s4 = sshll.u32 (!%p134_p10), %s405_s12, 7  ;;  %s156_s5 = scalar_lea.vmem (!%p134_p10), [#allocation2], %s270_s28 }
  0x11   : > { %s194_s6 = sshll.u32 (!%p134_p10), %s156_s5, 4  ;;  %s501_s15 = scalar_lea.hbm (!%p134_p10), %s550_s2, %s273_s4  ;;  %s503_s6 = int_to_ptr.vmem [resolvable:$true] %s194_s6 }
  0x12   : > { %s180_s16 = scalar_lea.sflag (!%p134_p10), [#allocation3], %s154_s26  ;;  %s335_s18 = scalar_lea.vmem (!%p134_p10), %s503_s6, 128 }
  0x13   : > { %p336_p12 = scmp.ne.s32.totalorder (!%p134_p10), %s503_s6, %s335_s18 }
  0x14   : > { %334 = vset.pattern.permute.xlu0 (!%p134_p10), %v416_v2 }
  0x15   : > { %173 = vperm.xlu0 (!%p134_p10), %334, %v165_v0   ;;  %p337_p13 = pnand (!%p134_p10), %p336_p12, %p473_p4 }
  0x16   : > { %s158_s25 = scalar_select %p157_p11, %s405_s12, 1 }
  0x17   : > { %p338_p0 = pneg %p337_p13  ;;  %s417_s12 = smov [#allocation2]  }
  0x18   : > { %s271_s27 = sshll.u32 %s158_s25, 3  ;;  %s339_s20 = sshll.u32 %s417_s12, 4  ;;  %s340_s20 = int_to_ptr.vmem [resolvable:$false] %s339_s20 }
  0x19   : > { %s163_s3 = scalar_lea.vmem %s548_s0, %s271_s27  ;;  %s341_s23 = scalar_lea.vmem %s340_s20, 256 }
  0x1a   : > { %v164_v4 = vld [vmem:[%s163_s3] sm:$0xff]  ;;  %p342_p1 = scmp.lt.s32.totalorder %s503_s6, %s340_s20  ;;  %p343_p2 = scmp.lt.s32.totalorder %s341_s23, %s335_s18 }
  0x1c   : > { %p344_p3 = por %p343_p2, %p342_p1 }
  0x1e   : > { %p345_p5 = pnand %p344_p3, %p338_p0 }
  0x8f   : > { %v169_v3 = vpop.permute.xlu0 %168 }
  0x90   : > { %v171_v5 = vmul.f32 %v169_v3, %v164_v4 }
  0x94   : > { %v174_v6 = vpop.permute.xlu0 %173 }
  0x95   : > { %v176_v7 = vadd.f32 %v174_v6, %v171_v5 }
  0x97   : > { %178 = vst.msk [vmem:[%s156_s5] sm:$0xff] %vm177_vm0, %v176_v7 }
  0x98   : > { %348 = shalt.err (!%p345_p5)
}
  0x99   : > { %s349_s24 = scalar_lea.hbm %s501_s15, 128  ;;  %s353_s27 = scalar_lea.hbm %s550_s2, 256 }
  0x9a   : > { %p350_p6 = scmp.ne.s32.totalorder %s501_s15, %s349_s24  ;;  %p354_p10 = scmp.lt.u32.totalorder %s501_s15, %s550_s2 }
  0x9b   : > { %p355_p11 = scmp.lt.u32.totalorder %s353_s27, %s349_s24  ;;  %p357_p13 = scmp.lt.u32.totalorder %s349_s24, %s501_s15 }
  0x9c   : > { %p351_p7 = pnand %p350_p6, %p473_p4 }
  0x9d   : > { %p356_p12 = por %p355_p11, %p354_p10 }
  0x9e   : > { %p352_p9 = pneg %p351_p7 }
  0x9f   : > { %p358_p0 = por %p357_p13, %p356_p12 }
  0xa1   : > { %p359_p1 = pnand %p358_p0, %p352_p9 }
  0xa3   : > { %362 = shalt.err (!%p359_p1)
}
  0xa4   : > { %276 = dma.vmem_to_hbm [thread:$0]  (%p473_p4), %s503_s6, 128, %s501_s15, %s180_s16  }
  0xa5 PF: > { %p282_p2 = scmp.ge.s32.totalorder %s413_s14, 2  ;;  %s206_s30 = sand.u32 1, %s393_s9  }
  0xa6   : > { %s207_s3 = scalar_lea.sflag [#allocation3], %s206_s30 }
  0xa7   : > { %p279_p3 = pnand %p282_p2, %p480_p8 }
  0xa9   : > { %388 = dma.done.wait (!%p279_p3), %s207_s3, 128  }
  0xaa   : > { %390 = vsyncadd (!%p279_p3), %s207_s3, 4294967168  ;;  %s15_s14 = sadd.s32 1, %s413_s14   ;;  %s553_s9 = smov %s397_s10 }
  0xab   : > { %p12_p5 = scmp.ge.s32.totalorder %s15_s14, 4   ;;  %s554_s10 = smov %s401_s11 }
  0xac   : > { %s555_s11 = smov %s486_s22  ;;  %s556_s12 = smov %s409_s13 }
  0xad   : > { %s557_s13 = smov %s559_s17  ;;  %14 = sbr.rel (!%p12_p5) target bundleno = 4 (0x4), region = 63 }
  0xb4   :  { %212 = vsyncpa [#allocation3], 1 }
  0xb5   :  { %214 = vsyncpa [#allocation3 + $0x1], 1 }

// kernel: conv_block1d.3
= control target key start
LH: loop header
LB: loop body
LE: loop exit
PB: predicated region body
PF: predicated region fallthrough
CT: control target
= control target key end

     0   :  { %s885_s24 = smov 0   ;;  %s887_s25 = smov 0   ;;  %s972_s0 = inlined_call_operand.vmem [shape: f32[2,4,16], index: 0, kind: input, shape index: {}]   ;;  %s973_s1 = inlined_call_operand.vmem [shape: f32[2,4,1], index: 1, kind: input, shape index: {}, may-alias: {1,2}]   ;;  %s974_s2 = inlined_call_operand.vmem [shape: f32[2,4,1], index: 2, kind: input, shape index: {}, may-alias: {1,2}]   ;;  %s975_s3 = inlined_call_operand.vmem [shape: f32[3,8,4], index: 3, kind: input, shape index: {}]   ;;  %s976_s4 = inlined_call_operand.vmem [shape: f32[8,1], index: 4, kind: input, shape index: {}]   ;;  %s977_s5 = inlined_call_operand.vmem [shape: f32[4,2], index: 5, kind: input, shape index: {}]   ;;  %s978_s6 = inlined_call_operand.vmem [shape: f32[2,8,16], index: 6, kind: output, shape index: {0}]   ;;  %s979_s7 = inlined_call_operand.vmem [shape: f32[8,128], index: 7, kind: output, shape index: {1}]  }
   0x1   :  { %s889_s26 = smov 0  }
   0x2 LB: > { %s30_s5 = sadd.s32 1, %s832_s25  ;;  %p743_p0 = scmp.ge.s32.totalorder %s836_s26, 1  ;;  %s836_s26 = sphi %s889_s26, %s18_s26   ;;  %s832_s25 = sphi %s887_s25, %s981_s25   ;;  %s828_s24 = sphi %s885_s24, %s980_s24  }
   0x3   : > { %p32_p1 = scmp.ge.s32.totalorder %s30_s5, 2  ;;  %p279_p2 = scmp.lt.s32.totalorder %s836_s26, 3 }
   0x5   : > { %s983_s5 = smov (%p32_p1, %s30_s5), 0  ;;  %p280_p3 = pnand %p743_p0, %p279_p2 }
   0x6   : > { %p325_p4 = scmp.lt.s32.totalorder (!%p280_p3), %s828_s24, 1  ;;  %p351_p5 = scmp.eq.s32.totalorder (!%p280_p3), %s828_s24, 0 }
   0x7   : > { %283 = sbr.rel (%p280_p3) target bundleno = 517 (0x205), region = 44 }
   0xe   : > { %s985_s24 = smov (!%p325_p4, %s828_s24), 1  ;;  %356 = sbr.rel (!%p351_p5) target bundleno = 21 (0x15), region = 48 }
   0xf   : > { %s903_s27 = sshll.u32 %s985_s24, 2  ;;  %s747_s28 = sshll.u32 %s985_s24, 3  ;;  %v838_v0 = vmov (%p351_p5), 0.0  }
  0x10   : > { %s331_s8 = scalar_lea.vmem %s972_s0, %s903_s27  ;;  %s336_s11 = scalar_lea.vmem %s973_s1, %s903_s27  ;;  %357 = vst [vmem:[%s979_s7] sm:$0xff] (%p351_p5), %v838_v0 }
  0x11   : > { %s342_s14 = scalar_lea.vmem %s974_s2, %s903_s27  ;;  %s920_s17 = scalar_lea.vmem %s978_s6, %s747_s28 }
  0x15 PF: > { %v358_v1 = vld [vmem:[%s331_s8] sm:$0xf]  ;;  %s839_s20 = smov 1   ;;  %s840_s21 = smov 15   ;;  %vm383_vm0 = vcmask 1043456   ;;  %v841_v3 = vmov 0.0  }
  0x16   : > { %v360_v2 = vld [vmem:[%s342_s14] sm:$0xf]  ;;  %362 = vrot.lane.b32.xlu0 %v358_v1, %s839_s20  ;;  %766 = vmatprep.subr.mxu0 %v841_v3  ;;  %v749_v4 = vld [vmem:[%s975_s3 + $0x8] sm:$0xff]  ;;  %vm379_vm1 = vcmask 31744   ;;  %vm842_vm2 = vmmov 0   ;;  %s843_s29 = smov 127  }
  0x17   : > { %371 = vrot.lane.b32.xlu1 %v360_v2, %s840_s21  ;;  %771 = vmatprep.subr.mxu1 %v841_v3  ;;  %v611_v5 = vld [vmem:[%s976_s4] sm:$0xff]  ;;  %v844_v6 = vmov 0   ;;  %vm365_vm3 = vcmask 7168   ;;  %vm374_vm4 = vcmask 121856   ;;  %v754_v13 = vld [vmem:[%s975_s3 + $0x10] sm:$0xff]  ;;  %vm619_vm5 = vcmask 130048  }
  0x18   : > { %767 = vmatpush3.msk.msra.mxu0 %vm383_vm0, %v358_v1  ;;  %768 = vmatprep.mubr.msk.f32.mxu0 %vm842_vm2, %v841_v3  ;;  %v359_v7 = vld [vmem:[%s336_s11] sm:$0xf]  ;;  %vm633_vm6 = vcmask 15368  }
  0x19   : > { %769 = vmatmul.mubr.msk.f32.vlgmr.msra.gmra.mrb[0].mxu0 %vm379_vm1, %v749_v4  ;;  %773 = vmatprep.mubr.msk.f32.mxu1 %vm842_vm2, %v841_v3  ;;  %v376_v9 = vld [vmem:[%s975_s3] sm:$0xff] }
  0x1a   : > { %367 = vrot.lane.b32.xlu0 %v358_v1, %s843_s29  ;;  %776 = vmatprep.subr.mxu0 %v841_v3  ;;  %v621_v29 = vld [vmem:[%s979_s7] sm:$0xff] }
  0x1b   : > { %778 = vmatprep.mubr.msk.f32.mxu0 %vm842_vm2, %v841_v3  ;;  %812 = vset.pattern.permute.xlu1 %v844_v6 }
  0x1c   : > { %614 = vperm.xlu1 %812, %v611_v5   ;;  %813 = vset.pattern.permute.xlu0 %v844_v6 }
  0x88   : > { %v363_v8 = vpop.permute.xlu0 %362 }
  0x89   : > { %v366_v10 = vsel %vm365_vm3, %v359_v7, %v363_v8  ;;  %v372_v11 = vpop.permute.xlu1 %371 }
  0x8a   : > { %772 = vmatpush3.msk.msra.mxu1 %vm383_vm0, %v366_v10 }
  0x8b   : > { %774 = vmatmul.mubr.msk.f32.vlgmr.msra.gmra.mrb[0].mxu1 %vm379_vm1, %v376_v9 }
  0x8c   : > { %v368_v12 = vpop.permute.xlu0 %367 }
  0x8d   : > { %v375_v14 = vsel %vm374_vm4, %v368_v12, %v372_v11 }
  0x8e   : > { %777 = vmatpush3.msk.msra.mxu0 %vm383_vm0, %v375_v14 }
  0x8f   : > { %779 = vmatmul.mubr.msk.f32.vlgmr.msra.gmra.mrb[2].mxu0 %vm379_vm1, %v754_v13 }
  0x9b   : > { %v615_v21 = vpop.permute.xlu1 %614 }
  0xec   : > { %v452_v15 = vpop.f32.mrb[0].mxu0 }
  0xed   : > { %v770_v16 = vpop.f32.mrb[1].mxu0 }
 0x15e   : > { %v528_v17 = vpop.f32.mrb[0].mxu1 }
 0x15f   : > { %v529_v18 = vadd.f32 %v528_v17, %v452_v15  ;;  %v775_v19 = vpop.f32.mrb[1].mxu1 }
 0x162   : > { %v606_v20 = vpop.f32.mrb[2].mxu0 }
 0x163   : > { %v610_v22 = vadd.f32 %v606_v20, %v529_v18  ;;  %v780_v23 = vpop.f32.mrb[3].mxu0 }
 0x165   : > { %v617_v24 = vadd.f32 %v615_v21, %v610_v22 }
 0x167   : > { %v618_v25 = vmax.f32 %v617_v24, 0.0 }
 0x169   : > { %v622_v26 = vsel %vm619_vm5, %v618_v25, 0.0  ;;  %620 = vst.msk [vmem:[%s920_s17] sm:$0xff] %vm619_vm5, %v618_v25  ;;  %v628_v27 = vmul.f32 %v618_v25, %v618_v25 }
 0x16a   : > { %623 = vadd.xlane.f32.xlu0 %v622_v26 }
 0x16b   : > { %v629_v28 = vsel %vm619_vm5, %v628_v27, 0.0 }
 0x16c   : > { %630 = vadd.xlane.f32.xlu1 %v629_v28 }
 0x1f7   : > { %v624_v30 = vpop.xlane.xlu0 %623 }
 0x1f8   : > { %v625_v31 = vadd.f32 %v624_v30, %v621_v29 }
 0x1f9   : > { %v631_v32 = vpop.xlane.xlu1 %630 }
 0x1fa   : > { %626 = vst.msk [vmem:[%s979_s7] sm:$0xff] %vm365_vm3, %v625_v31 }
 0x201   : > { %v627_v33 = vld [vmem:[%s979_s7] sm:$0xff] }
 0x202   : > { %v632_v34 = vadd.f32 %v631_v32, %v627_v33 }
 0x204   : > { %634 = vst.msk [vmem:[%s979_s7] sm:$0xff] %vm633_vm6, %v632_v34 }
 0x205 PF: > { %s18_s26 = sadd.s32 1, %s836_s26   ;;  %s980_s24 = smov %s832_s25 }
 0x206   : > { %p15_p6 = scmp.ge.s32.totalorder %s18_s26, 4   ;;  %s981_s25 = smov %s983_s5 }
 0x208   :  { %17 = sbr.rel (!%p15_p6) target bundleno = 2 (0x2), region = 94 }

// kernel: conv_block1d.4
= control target key start
LH: loop header
LB: loop body
LE: loop exit
PB: predicated region body
PF: predicated region fallthrough
CT: control target
= control target key end

     0   :  { %s888_s24 = smov 0   ;;  %s890_s25 = smov 0   ;;  %s986_s0 = inlined_call_operand.vmem [shape: f32[2,8,16], index: 0, kind: input, shape index: {}]   ;;  %s987_s1 = inlined_call_operand.vmem [shape: f32[2,8,1], index: 1, kind: input, shape index: {}, may-alias: {1,2}]   ;;  %s988_s2 = inlined_call_operand.vmem [shape: f32[2,8,1], index: 2, kind: input, shape index: {}, may-alias: {1,2}]   ;;  %s989_s3 = inlined_call_operand.vmem [shape: f32[3,8,8], index: 3, kind: input, shape index: {}]   ;;  %s990_s4 = inlined_call_operand.vmem [shape: f32[8,1], index: 4, kind: input, shape index: {}]   ;;  %s991_s5 = inlined_call_operand.vmem [shape: f32[8,2], index: 5, kind: input, shape index: {}]   ;;  %s992_s6 = inlined_call_operand.vmem [shape: f32[2,8,16], index: 6, kind: output, shape index: {0}]   ;;  %s993_s7 = inlined_call_operand.vmem [shape: f32[8,128], index: 7, kind: output, shape index: {1}]  }
   0x1   :  { %s892_s26 = smov 0  }
   0x2 LB: > { %s30_s27 = sadd.s32 1, %s834_s25  ;;  %p746_p0 = scmp.ge.s32.totalorder %s838_s26, 1  ;;  %s838_s26 = sphi %s892_s26, %s18_s26   ;;  %s834_s25 = sphi %s890_s25, %s995_s25   ;;  %s830_s24 = sphi %s888_s24, %s994_s24  }
   0x3   : > { %p32_p1 = scmp.ge.s32.totalorder %s30_s27, 2  ;;  %p279_p2 = scmp.lt.s32.totalorder %s838_s26, 3 }
   0x5   : > { %s997_s27 = smov (%p32_p1, %s30_s27), 0  ;;  %p280_p3 = pnand %p746_p0, %p279_p2 }
   0x6   : > { %p325_p4 = scmp.lt.s32.totalorder (!%p280_p3), %s830_s24, 1  ;;  %p351_p5 = scmp.eq.s32.totalorder (!%p280_p3), %s830_s24, 0 }
   0x7   : > { %283 = sbr.rel (%p280_p3) target bundleno = 657 (0x291), region = 44 }
   0xe   : > { %s999_s24 = smov (!%p325_p4, %s830_s24), 1  ;;  %356 = sbr.rel (!%p351_p5) target bundleno = 21 (0x15), region = 48 }
   0xf   : > { %s906_s28 = sshll.u32 %s999_s24, 3  ;;  %v840_v0 = vmov (%p351_p5), 0.0  }
  0x10   : > { %s331_s8 = scalar_lea.vmem %s986_s0, %s906_s28  ;;  %s336_s11 = scalar_lea.vmem %s987_s1, %s906_s28  ;;  %357 = vst [vmem:[%s993_s7] sm:$0xff] (%p351_p5), %v840_v0 }
  0x11   : > { %s342_s14 = scalar_lea.vmem %s988_s2, %s906_s28  ;;  %s350_s17 = scalar_lea.vmem %s992_s6, %s906_s28 }
  0x15 PF: > { %v361_v1 = vld [vmem:[%s991_s5] sm:$0xff]  ;;  %v841_v2 = vmov 0   ;;  %v842_v3 = vmov 1   ;;  %v843_v4 = vmov 0.0   ;;  %vm844_vm0 = vmmov 0   ;;  %v752_v11 = vld [vmem:[%s989_s3 + $0x8] sm:$0xff] }
  0x16   : > { %813 = vset.pattern.permute.xlu0 %v841_v2  ;;  %766 = vmatprep.subr.mxu0 %v843_v4  ;;  %v358_v6 = vld [vmem:[%s331_s8] sm:$0xff]  ;;  %vm391_vm1 = vcmask 64512   ;;  %s845_s30 = smov 1   ;;  %s846_s8 = smov 127   ;;  %vm377_vm2 = vcmask 7168   ;;  %vm386_vm3 = vcmask 121856  }
  0x17   : > { %364 = vperm.xlu0 %813, %v361_v1   ;;  %771 = vmatprep.subr.mxu1 %v843_v4  ;;  %v614_v9 = vld [vmem:[%s990_s4] sm:$0xff]  ;;  %s847_s12 = smov 15   ;;  %v755_v19 = vld [vmem:[%s989_s3 + $0x10] sm:$0xff]  ;;  %vm622_vm4 = vcmask 130048   ;;  %vm636_vm5 = vcmask 15368  }
  0x18   : > { %768 = vmatprep.mubr.msk.f32.mxu0 %vm844_vm0, %v843_v4  ;;  %773 = vmatprep.mubr.msk.f32.mxu1 %vm844_vm0, %v843_v4  ;;  %v360_v12 = vld [vmem:[%s342_s14] sm:$0xff] }
  0x19   : > { %v359_v13 = vld [vmem:[%s336_s11] sm:$0xff] }
  0x1a   : > { %v388_v15 = vld [vmem:[%s989_s3] sm:$0xff] }
  0x1b   : > { %814 = vset.pattern.permute.xlu0 %v842_v3  ;;  %v624_v35 = vld [vmem:[%s993_s7] sm:$0xff] }
  0x1c   : > { %369 = vperm.xlu0 %814, %v361_v1  }
  0x20   : > { %815 = vset.pattern.permute.xlu0 %v841_v2 }
  0x21   : > { %617 = vperm.xlu0 %815, %v614_v9  }
  0x96   : > { %v365_v5 = vpop.permute.xlu0 %364 }
  0x97   : > { %v367_v7 = vmul.f32 %v365_v5, %v358_v6 }
  0x9b   : > { %v370_v8 = vpop.permute.xlu0 %369 }
  0x9c   : > { %v372_v10 = vadd.f32 %v370_v8, %v367_v7 }
  0x9e   : > { %374 = vrot.lane.b32.xlu1 %v372_v10, %s845_s30  ;;  %767 = vmatpush3.msra.mxu0 %v372_v10 }
  0x9f   : > { %769 = vmatmul.mubr.msk.f32.vlgmr.msra.gmra.mrb[0].mxu0 %vm391_vm1, %v752_v11  ;;  %776 = vmatprep.subr.mxu0 %v843_v4 }
  0xa0   : > { %778 = vmatprep.mubr.msk.f32.mxu0 %vm844_vm0, %v843_v4  ;;  %v618_v27 = vpop.permute.xlu0 %617 }
  0xa2   : > { %379 = vrot.lane.b32.xlu1 %v372_v10, %s846_s8 }
  0xa6   : > { %383 = vrot.lane.b32.xlu1 %v360_v12, %s847_s12 }
 0x110   : > { %v375_v14 = vpop.permute.xlu1 %374 }
 0x111   : > { %v378_v16 = vsel %vm377_vm2, %v359_v13, %v375_v14 }
 0x112   : > { %772 = vmatpush3.msra.mxu1 %v378_v16 }
 0x113   : > { %774 = vmatmul.mubr.msk.f32.vlgmr.msra.gmra.mrb[0].mxu1 %vm391_vm1, %v388_v15 }
 0x114   : > { %v380_v17 = vpop.permute.xlu1 %379 }
 0x118   : > { %v384_v18 = vpop.permute.xlu1 %383 }
 0x119   : > { %v387_v20 = vsel %vm386_vm3, %v380_v17, %v384_v18 }
 0x11a   : > { %777 = vmatpush3.msra.mxu0 %v387_v20 }
 0x11b   : > { %779 = vmatmul.mubr.msk.f32.vlgmr.msra.gmra.mrb[2].mxu0 %vm391_vm1, %v755_v19 }
 0x172   : > { %v461_v21 = vpop.f32.mrb[0].mxu0 }
 0x173   : > { %v770_v22 = vpop.f32.mrb[1].mxu0 }
 0x1e6   : > { %v534_v23 = vpop.f32.mrb[0].mxu1 }
 0x1e7   : > { %v535_v24 = vadd.f32 %v534_v23, %v461_v21  ;;  %v775_v25 = vpop.f32.mrb[1].mxu1 }
 0x1ee   : > { %v609_v26 = vpop.f32.mrb[2].mxu0 }
 0x1ef   : > { %v613_v28 = vadd.f32 %v609_v26, %v535_v24  ;;  %v780_v29 = vpop.f32.mrb[3].mxu0 }
 0x1f1   : > { %v620_v30 = vadd.f32 %v618_v27, %v613_v28 }
 0x1f3   : > { %v621_v31 = vmax.f32 %v620_v30, 0.0 }
 0x1f5   : > { %v625_v32 = vsel %vm622_vm4, %v621_v31, 0.0  ;;  %623 = vst.msk [vmem:[%s350_s17] sm:$0xff] %vm622_vm4, %v621_v31  ;;  %v631_v33 = vmul.f32 %v621_v31, %v621_v31 }
 0x1f6   : > { %626 = vadd.xlane.f32.xlu1 %v625_v32 }
 0x1f7   : > { %v632_v34 = vsel %vm622_vm4, %v631_v33, 0.0 }
 0x1f8   : > { %633 = vadd.xlane.f32.xlu0 %v632_v34 }
 0x283   : > { %v627_v36 = vpop.xlane.xlu1 %626 }
 0x284   : > { %v628_v37 = vadd.f32 %v627_v36, %v624_v35 }
 0x285   : > { %v634_v38 = vpop.xlane.xlu0 %633 }
 0x286   : > { %629 = vst.msk [vmem:[%s993_s7] sm:$0xff] %vm377_vm2, %v628_v37 }
 0x28d   : > { %v630_v39 = vld [vmem:[%s993_s7] sm:$0xff] }
 0x28e   : > { %v635_v40 = vadd.f32 %v634_v38, %v630_v39 }
 0x290   : > { %637 = vst.msk [vmem:[%s993_s7] sm:$0xff] %vm636_vm5, %v635_v40 }
 0x291 PF: > { %s18_s26 = sadd.s32 1, %s838_s26   ;;  %s994_s24 = smov %s834_s25 }
 0x292   : > { %p15_p6 = scmp.ge.s32.totalorder %s18_s26, 4   ;;  %s995_s25 = smov %s997_s27 }
 0x294   :  { %17 = sbr.rel (!%p15_p6) target bundleno = 2 (0x2), region = 94 }

</bundles_post_ra>
